<compile_context>
chip_gen: v6e
topology: v6e:2x2x1
jax: 0.10.0
libtpu: 0.0.40
codegen_flags: <defaults>
</compile_context>

<pallas_src>
import functools

import jax
import jax.numpy as jnp
from jax.experimental import pallas as pl
from jax.experimental.pallas import tpu as pltpu


def _round_up(n, m):
    return ((n + m - 1) // m) * m


# -----------------------------------------------------------------------------
# Kernel: one batch tile of the kernel_size=1 Conv1d + flatten.
# -----------------------------------------------------------------------------
def _conv1x1_kernel(x_ref, w_ref, b_ref, o_ref, *, C, L, O):
    # x_ref: [TILE_B, C * L]  (VMEM)  channels flattened into lanes
    # w_ref: [O, C]           (SMEM)  Conv1d weight, kernel dim squeezed
    # b_ref: [O]              (SMEM)  Conv1d bias
    # o_ref: [TILE_B, O * L]  (VMEM)  flattened output (x.view(B, -1))
    for o in range(O):                       # static unroll; O is tiny (default 1)
        # Initialize with first channel term + bias (no zeros pass).
        acc = w_ref[o, 0] * x_ref[:, 0:L].astype(jnp.float32) + b_ref[o]
        for c in range(1, C):                # static unroll; C is tiny (default 3)
            acc = acc + w_ref[o, c] * x_ref[:, c * L:(c + 1) * L].astype(jnp.float32)
        o_ref[:, o * L:(o + 1) * L] = acc.astype(o_ref.dtype)


# -----------------------------------------------------------------------------
# Wrapper: grid/BlockSpec setup, pallas_call.
# -----------------------------------------------------------------------------
def conv_transform2_forward(x, weight, bias, *, tile_b=1024, out_dtype=None):
    """x: [B, C, L]; weight: [O, C, 1] (torch Conv1d layout); bias: [O].

    Returns the flattened conv output [B, O * L] (== conv(x).view(B, -1)).
    """
    B, C, L = x.shape
    O = weight.shape[0]
    out_dtype = x.dtype if out_dtype is None else out_dtype

    w2d = weight.reshape(O, C).astype(jnp.float32)   # kernel_size == 1 squeeze
    b1d = bias.reshape(O).astype(jnp.float32)

    # Channels folded into lanes: free row-major view, lane-aligned reads.
    x2d = x.reshape(B, C * L)

    # Batch tile: multiple of 8; keep >= 2 grid steps when possible so the
    # "parallel" axis shards across v7x's two TensorCores; cap per-step VMEM
    # (x tile + out tile, double-buffered) well under scoped defaults.
    tile_b = min(tile_b, max(8, _round_up(-(-B // 2), 8)))
    vmem_budget = 8 * 1024 * 1024                      # bytes, conservative
    bytes_per_row = 2 * (C * L + O * L) * 4            # 2 buffers, f32 upper bound
    tile_b = min(tile_b, max(8, (vmem_budget // bytes_per_row) // 8 * 8))
    grid = (pl.cdiv(B, tile_b),)                       # ragged last block is masked

    kernel = functools.partial(_conv1x1_kernel, C=C, L=L, O=O)

    out = pl.pallas_call(
        kernel,
        out_shape=jax.ShapeDtypeStruct((B, O * L), out_dtype),
        grid=grid,
        in_specs=[
            pl.BlockSpec((tile_b, C * L), lambda i: (i, 0)),
            pl.BlockSpec(memory_space=pltpu.MemorySpace.SMEM),
            pl.BlockSpec(memory_space=pltpu.MemorySpace.SMEM),
        ],
        out_specs=pl.BlockSpec((tile_b, O * L), lambda i: (i, 0)),
        compiler_params=pltpu.CompilerParams(
            dimension_semantics=("parallel",)),        # megacore sharding on v7x
    )(x2d, w2d, b1d)

    return out


# -----------------------------------------------------------------------------
# Plain-JAX reference (mirrors the PyTorch forward) for a sanity check.
# -----------------------------------------------------------------------------
def reference_forward(x, weight, bias):
    y = jnp.einsum('bcl,oc->bol', x, weight[:, :, 0]) + bias[None, :, None]
    return y.reshape(y.shape[0], -1)


if __name__ == "__main__":
    # Small shapes consistent with the module defaults:
    # input_channels=3, output_channels=1, kernel_size=1.
    # B=10 also exercises the ragged last-block (masked output) path.
    B, C, O, L = 10, 3, 1, 128

    key = jax.random.PRNGKey(0)
    kx, kw, kb = jax.random.split(key, 3)
    x = jax.random.normal(kx, (B, C, L), jnp.float32)
    weight = jax.random.normal(kw, (O, C, 1), jnp.float32) * 0.1
    bias = jax.random.normal(kb, (O,), jnp.float32) * 0.1

    out = conv_transform2_forward(x, weight, bias)
    out = jax.block_until_ready(out)

    ref = reference_forward(x, weight, bias)
    assert out.shape == (B, O * L), out.shape
    assert jnp.allclose(out, ref, atol=1e-5, rtol=1e-5), "mismatch vs reference"
    print("KERNEL_OK")
</pallas_src>

<mosaic_0001>
module attributes {stable_mosaic.version = 11 : i64} {
  func.func @_conv1x1_kernel(%arg0: i32, %arg1: memref<8x384xf32, #tpu.memory_space<vmem>>, %arg2: memref<1x3xf32, #tpu.memory_space<smem>>, %arg3: memref<1xf32, #tpu.memory_space<smem>>, %arg4: memref<8x128xf32, #tpu.memory_space<vmem>>) attributes {dimension_semantics = [#tpu.dimension_semantics<parallel>], iteration_bounds = array<i64: 2>, scalar_prefetch = 0 : i64, scratch_operands = 0 : i64, tpu.core_type = #tpu.core_type<tc>, window_params = [{transform_indices = @transform_0, window_bounds = array<i64: 8, 384>}, {transform_indices = @transform_1, window_bounds = array<i64: 1, 3>}, {transform_indices = @transform_2, window_bounds = array<i64: 1>}, {transform_indices = @transform_3, window_bounds = array<i64: 8, 128>}]} {
    %c0 = arith.constant 0 : index
    %c0_0 = arith.constant 0 : index
    %0 = memref.load %arg2[%c0, %c0_0] : memref<1x3xf32, #tpu.memory_space<smem>>
    %c0_1 = arith.constant 0 : index
    %c0_2 = arith.constant 0 : index
    %1 = vector.load %arg1[%c0_1, %c0_2] : memref<8x384xf32, #tpu.memory_space<vmem>>, vector<8x128xf32>
    %2 = vector.broadcast %0 : f32 to vector<8x128xf32>
    %3 = arith.mulf %2, %1 : vector<8x128xf32>
    %c0_3 = arith.constant 0 : index
    %4 = memref.load %arg3[%c0_3] : memref<1xf32, #tpu.memory_space<smem>>
    %5 = vector.broadcast %4 : f32 to vector<8x128xf32>
    %6 = arith.addf %3, %5 : vector<8x128xf32>
    %c0_4 = arith.constant 0 : index
    %c1 = arith.constant 1 : index
    %7 = memref.load %arg2[%c0_4, %c1] : memref<1x3xf32, #tpu.memory_space<smem>>
    %c0_5 = arith.constant 0 : index
    %c128 = arith.constant 128 : index
    %8 = vector.load %arg1[%c0_5, %c128] : memref<8x384xf32, #tpu.memory_space<vmem>>, vector<8x128xf32>
    %9 = vector.broadcast %7 : f32 to vector<8x128xf32>
    %10 = arith.mulf %9, %8 : vector<8x128xf32>
    %11 = arith.addf %6, %10 : vector<8x128xf32>
    %c0_6 = arith.constant 0 : index
    %c2 = arith.constant 2 : index
    %12 = memref.load %arg2[%c0_6, %c2] : memref<1x3xf32, #tpu.memory_space<smem>>
    %c0_7 = arith.constant 0 : index
    %c256 = arith.constant 256 : index
    %13 = vector.load %arg1[%c0_7, %c256] : memref<8x384xf32, #tpu.memory_space<vmem>>, vector<8x128xf32>
    %14 = vector.broadcast %12 : f32 to vector<8x128xf32>
    %15 = arith.mulf %14, %13 : vector<8x128xf32>
    %16 = arith.addf %11, %15 : vector<8x128xf32>
    %c0_8 = arith.constant 0 : index
    %c0_9 = arith.constant 0 : index
    %17 = vector.load %arg4[%c0_8, %c0_9] : memref<8x128xf32, #tpu.memory_space<vmem>>, vector<8x128xf32>
    tpu.vector_store %arg4[%c0_8, %c0_9], %16 {strides = array<i32>} : memref<8x128xf32, #tpu.memory_space<vmem>>, vector<8x128xf32>,
    return
  }
  func.func @transform_0(%arg0: i32) -> (i32, i32) {
    %c0_i32 = arith.constant 0 : i32
    %c0_i32_0 = arith.constant 0 : i32
    return %arg0, %c0_i32 : i32, i32
  }
  func.func @transform_1(%arg0: i32) -> (i32, i32) {
    %c0_i32 = arith.constant 0 : i32
    %c0_i32_0 = arith.constant 0 : i32
    %c0_i32_1 = arith.constant 0 : i32
    return %c0_i32, %c0_i32_0 : i32, i32
  }
  func.func @transform_2(%arg0: i32) -> i32 {
    %c0_i32 = arith.constant 0 : i32
    %c0_i32_0 = arith.constant 0 : i32
    return %c0_i32 : i32
  }
  func.func @transform_3(%arg0: i32) -> (i32, i32) {
    %c0_i32 = arith.constant 0 : i32
    %c0_i32_0 = arith.constant 0 : i32
    return %arg0, %c0_i32 : i32, i32
  }
}

</mosaic_0001>

<bundles_post_ra>
// kernel: tpu_custom_call.1
= control target key start
LH: loop header
LB: loop body
LE: loop exit
PB: predicated region body
PF: predicated region fallthrough
CT: control target
= control target key end

     0   :  { %s702_s0 = inlined_call_operand.hbm [shape: f32[10,384], index: 0, kind: input, shape index: {}]   ;;  %s703_s1 = inlined_call_operand.vmem [shape: f32[1,3], index: 1, kind: input, shape index: {}]   ;;  %s704_s2 = inlined_call_operand.<no memory space> [shape: f32[1], index: 2, kind: input, shape index: {}]   ;;  %s705_s3 = inlined_call_operand.hbm [shape: f32[10,128], index: 3, kind: output, shape index: {}]  }
   0x1   :  { %8 = sst [smem:[#allocation2]] %s704_s2 }
   0x2   :  { %9 = vsyncpa [#allocation4], 0 }
   0x3   :  { %11 = vsyncpa [#allocation4 + $0x1], 0 }
   0x4   :  { %12 = vsyncpa [#allocation6], 0 }
   0x5   :  { %13 = vsyncpa [#allocation5], 0 }
   0x6   :  { %15 = vsyncpa [#allocation5 + $0x1], 0  ;;  %s529_s14 = smov 0   ;;  %s531_s15 = smov 0  }
   0x7   :  { %s533_s16 = smov 0   ;;  %s535_s17 = smov 0  }
   0x8 LB: > { %s550_s2 = sadd.s32 4294967295, %s501_s17   ;;  %s316_s18 = sadd.s32 4294967294, %s501_s17   ;;  %s501_s17 = sphi %s535_s17, %s728_s17   ;;  %s497_s16 = sphi %s533_s16, %s727_s16   ;;  %s493_s15 = sphi %s531_s15, %s726_s15   ;;  %s489_s14 = sphi %s529_s14, %s725_s14  }
   0x9   : > { %p41_p0 = scmp.ne.s32.totalorder %s493_s15, %s489_s14  ;;  %p706_p1 = scmp.eq.s32.totalorder %s550_s2, 0 }
   0xa   : > { %p113_p3 = scmp.eq.s32.totalorder %s316_s18, 1  ;;  %p317_p5 = scmp.ge.s32.totalorder %s501_s17, 1 }
   0xb   : > { %p559_p4 = por %p706_p1, %p41_p0  ;;  %p120_p7 = scmp.lt.s32.totalorder %s501_s17, 3 }
   0xc   : > { %p564_p6 = por %p113_p3, %p41_p0  ;;  %s133_s23 = sshll.u32 %s703_s1, 4  ;;  %s134_s23 = int_to_ptr.vmem [resolvable:$true] %s133_s23 }
   0xd   : > { %s710_s19 = scalar_select %p559_p4, 1, 0 }
   0xe   : > { %s711_s20 = scalar_select %p564_p6, 1, 0 }
   0xf   : > { %p572_p8 = pnand %p317_p5, %p120_p7  ;;  %s580_s25 = sadd.s32 1, %s501_s17  }
  0x10   : > { %s25_s27 = ssub.s32 %s501_s17, %s580_s25  ;;  %s28_s29 = sadd.s32 1, %s497_s16 }
  0x11   : > { %s712_s24 = scalar_select %p572_p8, 1, 0 }
  0x12   : > { %p341_p10 = pneg %p572_p8  ;;  %p590_p12 = scmp.eq.s32.totalorder %s25_s27, 0 }
  0x13   : > { %p35_p13 = scmp.ne.s32.totalorder %s497_s16, %s493_s15  ;;  %s390_s30 = scalar_lea.vmem %s134_s23, 16 }
  0x14   : > { %p584_p11 = pnand %p341_p10, %p706_p1  ;;  %p391_p0 = scmp.ne.s32.totalorder %s134_s23, %s390_s30 }
  0x15   : > { %p398_p9 = scmp.lt.s32.totalorder %s134_s23, %s134_s23  ;;  %p399_p2 = scmp.lt.s32.totalorder %s390_s30, %s390_s30 }
  0x16   : > { %p392_p3 = pneg %p584_p11 }
  0x17   : > { %p400_p10 = por %p399_p2, %p398_p9 }
  0x18   : > { %p393_p5 = pnand %p392_p3, %p391_p0 }
  0x1a   : > { %p394_p7 = pneg %p393_p5 }
  0x1c   : > { %p401_p1 = pnand %p400_p10, %p394_p7 }
  0x1e   : > { %404 = shalt.err (!%p401_p1)
}
  0x1f   : > { %s503_s4 = smov [#allocation7]   ;;  %p36_p2 = scmp.eq.s32.totalorder %s501_s17, 0 }
  0x20   : > { %344 = dma.vmem_to_smem (!%p584_p11), %s134_s23, 16, %s503_s4, [#allocation6]  }
  0x21   : > { %s604_s5 = scalar_select %p590_p12, %s497_s16, %s28_s29  }
  0x22   : > { %p715_p1 = scmp.eq.s32.totalorder %s550_s2, 1  ;;  %p354_p0 = scmp.lt.s32.totalorder %s501_s17, 2 }
  0x23   : > { %s147_s7 = sand.u32 1, %s497_s16   ;;  %p37_p3 = por %p36_p2, %p35_p13 }
  0x24   : > { %p612_p9 = por %p715_p1, %p35_p13  ;;  %s330_s8 = smul.u32 24, %s147_s7 }
  0x25   : > { %s331_s9 = smul.u32 384, %s501_s17  ;;  %p622_p5 = pnand %p354_p0, %p37_p3 }
  0x26   : > { %s716_s6 = scalar_select %p612_p9, 1, 0 }
  0x27   : > { %s629_s13 = scalar_lea.hbm %s702_s0, %s331_s9  ;;  %s151_s18 = scalar_lea.vmem [#allocation3], %s330_s8 }
  0x28   : > { %s159_s21 = sshll.u32 %s151_s18, 4  ;;  %s148_s22 = scalar_lea.sflag [#allocation4], %s147_s7  ;;  %s160_s21 = int_to_ptr.vmem [resolvable:$true] %s159_s21 }
  0x29   : > { %s405_s23 = scalar_lea.hbm %s629_s13, 384  ;;  %p407_p12 = pneg %p622_p5 }
  0x2a   : > { %p406_p11 = scmp.ne.s32.totalorder %s629_s13, %s405_s23  ;;  %s410_s28 = scalar_lea.hbm %s702_s0, 768 }
  0x2b   : > { %p411_p10 = scmp.lt.s32.totalorder %s629_s13, %s702_s0  ;;  %p412_p2 = scmp.lt.s32.totalorder %s410_s28, %s405_s23 }
  0x2c   : > { %p408_p13 = pnand %p407_p12, %p406_p11 }
  0x2d   : > { %p413_p1 = por %p412_p2, %p411_p10 }
  0x2e   : > { %p409_p7 = pneg %p408_p13 }
  0x30   : > { %p414_p0 = pnand %p413_p1, %p409_p7 }
  0x32   : > { %417 = shalt.err (!%p414_p0)
}
  0x33   : > { %s418_s4 = scalar_lea.vmem %s160_s21, 384  ;;  %s504_s7 = smov [#allocation3]  }
  0x34   : > { %p419_p3 = scmp.ne.s32.totalorder %s160_s21, %s418_s4  ;;  %s423_s8 = sshll.u32 %s504_s7, 4  ;;  %s424_s8 = int_to_ptr.vmem [resolvable:$false] %s423_s8 }
  0x35   : > { %s425_s9 = scalar_lea.vmem %s424_s8, 768  ;;  %p426_p11 = scmp.lt.s32.totalorder %s160_s21, %s424_s8 }
  0x36   : > { %p421_p6 = pnand %p419_p3, %p407_p12  ;;  %p427_p13 = scmp.lt.s32.totalorder %s425_s9, %s418_s4 }
  0x38   : > { %p422_p9 = pneg %p421_p6  ;;  %p428_p4 = por %p427_p13, %p426_p11 }
  0x3a   : > { %p429_p8 = pnand %p428_p4, %p422_p9 }
  0x3c   : > { %432 = shalt.err (!%p429_p8)
}
  0x3d   : > { %348 = dma.hbm_to_vmem [thread:$0]  (!%p622_p5), %s629_s13, 384, %s160_s21, %s148_s22  }
  0x3e   : > { %p718_p7 = scmp.ne.s32.totalorder %s712_s24, 0 }
  0x3f   : > { %s648_s11 = sand.u32 (!%p718_p7), 1, %s493_s15   ;;  %p719_p6 = scmp.ne.s32.totalorder (!%p718_p7), %s710_s19, 0 }
  0x40   : > { %168 = sbr.rel (%p718_p7) target bundleno = 104 (0x68), region = 32  ;;  %s171_s18 = scalar_lea.sflag (!%p718_p7), [#allocation4], %s648_s11 }
  0x41   : > { %s332_s12 = smul.u32 (!%p718_p7), 24, %s648_s11 }
  0x43   : > { %s174_s23 = scalar_lea.vmem (!%p718_p7), [#allocation3], %s332_s12 }
  0x45   : > { %476 = dma.done.wait (%p719_p6), %s171_s18, 384  }
  0x46   : > { %478 = vsyncadd (%p719_p6), %s171_s18, 4294966912  ;;  %p720_p4 = scmp.eq.s32.totalorder %s550_s2, 0 }
  0x48   : > { %480 = dma.done.wait (%p720_p4), [#allocation6], 16   ;;  %p721_p8 = pmov %p720_p4 }
  0x4a   : > { %482 = vsyncadd (%p721_p8), [#allocation6], 4294967280 }
  0x4b   : > { %183 = sfence }
  0x4c   : > { %s202_s24 = sld [smem:[#allocation7]]  ;;  %s323_s21 = sshll.u32 %s648_s11, 3  ;;  %v203_v0 = vld [vmem:[%s174_s23] sm:$0xff]  ;;  %v210_v2 = vld [vmem:[%s174_s23 + $0x8] sm:$0xff]  ;;  %v215_v5 = vld [vmem:[%s174_s23 + $0x10] sm:$0xff] }
  0x4d   : > { %s206_s10 = sld [smem:[#allocation2]]  ;;  %s201_s19 = scalar_lea.vmem [#allocation8], %s323_s21 }
  0x4e   : > { %s324_s13 = sld [smem:[#allocation7 + $0x1]]  ;;  %s234_s26 = sshll.u32 %s201_s19, 4  ;;  %s662_s26 = int_to_ptr.vmem [resolvable:$true] %s234_s26 }
  0x4f   : > { %s325_s22 = sld [smem:[#allocation7 + $0x2]]  ;;  %s327_s27 = sshll.u32 %s550_s2, 7 }
  0x50   : > { %s232_s30 = scalar_lea.hbm %s705_s3, %s327_s27  ;;  %s221_s4 = scalar_lea.sflag [#allocation5], %s648_s11 }
  0x51   : > { %s433_s7 = scalar_lea.vmem %s662_s26, 128  ;;  %p722_p5 = scmp.ne.s32.totalorder %s716_s6, 0 }
  0x52   : > { %v204_v1 = vstv %s202_s24  ;;  %p434_p9 = scmp.ne.s32.totalorder %s662_s26, %s433_s7  ;;  %s505_s8 = smov [#allocation8]  }
  0x53   : > { %v205_v3 = vmul.f32 %v204_v1, %v203_v0  ;;  %v207_v4 = vstv %s206_s10  ;;  %s437_s2 = sshll.u32 %s505_s8, 4  ;;  %s438_s2 = int_to_ptr.vmem [resolvable:$false] %s437_s2 }
  0x54   : > { %v211_v6 = vstv %s324_s13  ;;  %p435_p12 = pnand %p434_p9, %p722_p5  ;;  %s439_s9 = scalar_lea.vmem %s438_s2, 256 }
  0x55   : > { %v208_v7 = vadd.f32 %v207_v4, %v205_v3  ;;  %v212_v8 = vmul.f32 %v211_v6, %v210_v2  ;;  %v216_v9 = vstv %s325_s22  ;;  %p440_p2 = scmp.lt.s32.totalorder %s662_s26, %s438_s2  ;;  %p441_p1 = scmp.lt.s32.totalorder %s439_s9, %s433_s7 }
  0x56   : > { %v217_v10 = vmul.f32 %v216_v9, %v215_v5  ;;  %p436_p10 = pneg %p435_p12 }
  0x57   : > { %v213_v11 = vadd.f32 %v212_v8, %v208_v7  ;;  %p442_p0 = por %p441_p1, %p440_p2 }
  0x59   : > { %v218_v12 = vadd.f32 %v217_v10, %v213_v11  ;;  %p443_p3 = pnand %p442_p0, %p436_p10 }
  0x5b   : > { %219 = vst [vmem:[%s201_s19] sm:$0xff] %v218_v12 }
  0x5c   : > { %446 = shalt.err (!%p443_p3)
}
  0x5d   : > { %s447_s12 = scalar_lea.hbm %s232_s30, 128  ;;  %s451_s23 = scalar_lea.hbm %s705_s3, 256 }
  0x5e   : > { %p448_p11 = scmp.ne.s32.totalorder %s232_s30, %s447_s12  ;;  %p452_p6 = scmp.lt.s32.totalorder %s232_s30, %s705_s3 }
  0x5f   : > { %p453_p4 = scmp.lt.s32.totalorder %s451_s23, %s447_s12 }
  0x60   : > { %p449_p13 = pnand %p448_p11, %p722_p5 }
  0x61   : > { %p454_p8 = por %p453_p4, %p452_p6 }
  0x62   : > { %p450_p7 = pneg %p449_p13 }
  0x64   : > { %p455_p9 = pnand %p454_p8, %p450_p7 }
  0x66   : > { %458 = shalt.err (!%p455_p9)
}
  0x67   : > { %339 = dma.vmem_to_hbm [thread:$0]  (%p722_p5), %s662_s26, 128, %s232_s30, %s221_s4  }
  0x68 PF: > { %s246_s13 = sand.u32 1, %s489_s14   ;;  %p723_p12 = scmp.ne.s32.totalorder %s711_s20, 0 }
  0x69   : > { %p724_p10 = scmp.ge.s32.totalorder %s501_s17, 2  ;;  %s247_s21 = scalar_lea.sflag [#allocation5], %s246_s13 }
  0x6b   : > { %p350_p2 = pnand %p724_p10, %p723_p12 }
  0x6d   : > { %p351_p1 = pneg %p350_p2 }
  0x6f   : > { %484 = dma.done.wait (%p351_p1), %s247_s21, 128  }
  0x70   : > { %486 = vsyncadd (%p351_p1), %s247_s21, 4294967168  ;;  %p18_p0 = scmp.ge.s32.totalorder %s580_s25, 4   ;;  %s725_s14 = smov %s493_s15 }
  0x71   : > { %s726_s15 = smov %s497_s16  ;;  %s727_s16 = smov %s604_s5 }
  0x72   : > { %s728_s17 = smov %s580_s25  ;;  %20 = sbr.rel (!%p18_p0) target bundleno = 8 (0x8), region = 82 }
  0x77   :  { %252 = vsyncpa [#allocation4], 1 }
  0x78   :  { %254 = vsyncpa [#allocation4 + $0x1], 1 }
  0x79   :  { %255 = vsyncpa [#allocation5], 1 }
  0x7a   :  { %257 = vsyncpa [#allocation5 + $0x1], 1 }
  0x7b   :  { %258 = vsyncpa [#allocation6], 1 }
  0x7c   :  { %260 = vsyncpa [#allocation6 + $0x1], 1 }

</bundles_post_ra>
